<compile_context>
chip_gen: v7x
topology: tpu7x:2x2x1
jax: 0.10.0
libtpu: 0.0.40
codegen_flags: <defaults>
</compile_context>

<pallas_src>
import functools

import numpy as np
import jax
import jax.numpy as jnp
from jax import lax
from jax.experimental import pallas as pl
from jax.experimental.pallas import tpu as pltpu

_INV_SQRT2 = 0.7071067811865476   # hoisted constant for exact GELU
_LN_EPS = 1e-5                    # PyTorch nn.LayerNorm default eps


# ---------------------------------------------------------------------------
# in-kernel helpers (operate on f32 tiles)
# ---------------------------------------------------------------------------
def _gelu_exact(x):
    # PyTorch F.gelu default: exact erf-based GELU.
    return 0.5 * x * (1.0 + lax.erf(x * _INV_SQRT2))


def _layernorm_f32(x, gamma, beta):
    mu = jnp.mean(x, axis=-1, keepdims=True)
    xc = x - mu
    var = jnp.mean(xc * xc, axis=-1, keepdims=True)
    return (xc * lax.rsqrt(var + _LN_EPS) * gamma.astype(jnp.float32)
            + beta.astype(jnp.float32))


# ---------------------------------------------------------------------------
# kernels (row-tiled over tokens; weights resident in VMEM)
# ---------------------------------------------------------------------------
def _linear_kernel(x_ref, w_ref, b_ref, o_ref):
    acc = jnp.dot(x_ref[...], w_ref[...], preferred_element_type=jnp.float32)
    o_ref[...] = (acc + b_ref[...].astype(jnp.float32)).astype(o_ref.dtype)


def _linear_residual_kernel(x_ref, res_ref, w_ref, b_ref, o_ref):
    acc = jnp.dot(x_ref[...], w_ref[...], preferred_element_type=jnp.float32)
    acc = acc + b_ref[...].astype(jnp.float32) + res_ref[...].astype(jnp.float32)
    o_ref[...] = acc.astype(o_ref.dtype)


def _ln_linear_kernel(x_ref, g_ref, beta_ref, w_ref, b_ref, o_ref):
    h = _layernorm_f32(x_ref[...].astype(jnp.float32), g_ref[...], beta_ref[...])
    acc = jnp.dot(h.astype(w_ref.dtype), w_ref[...],
                  preferred_element_type=jnp.float32)
    o_ref[...] = (acc + b_ref[...].astype(jnp.float32)).astype(o_ref.dtype)


def _ffn_block_kernel(x_ref, g_ref, beta_ref, w1_ref, b1_ref, w2_ref, b2_ref, o_ref):
    # out = x + fc2(gelu(fc1(LN(x))))   (exact erf GELU, f32 accumulation)
    x = x_ref[...].astype(jnp.float32)
    h = _layernorm_f32(x, g_ref[...], beta_ref[...])
    h = jnp.dot(h.astype(w1_ref.dtype), w1_ref[...],
                preferred_element_type=jnp.float32)
    h = _gelu_exact(h + b1_ref[...].astype(jnp.float32))
    o = jnp.dot(h.astype(w2_ref.dtype), w2_ref[...],
                preferred_element_type=jnp.float32)
    o_ref[...] = (x + o + b2_ref[...].astype(jnp.float32)).astype(o_ref.dtype)


def _attn_core_kernel(q_ref, k_ref, v_ref, o_ref, *, scale):
    # One (batch, head) pair per grid step; S x S score matrix stays on-chip.
    q = q_ref[...].astype(jnp.float32)                          # (S, d)
    k = k_ref[...].astype(jnp.float32)                          # (S, d)
    v = v_ref[...].astype(jnp.float32)                          # (S, d)
    s = lax.dot_general(q, k, (((1,), (1,)), ((), ())),         # q @ k.T (no transpose op)
                        preferred_element_type=jnp.float32) * scale
    s = s - jnp.max(s, axis=-1, keepdims=True)
    p = jnp.exp(s)
    p = p * pl.reciprocal(jnp.sum(p, axis=-1, keepdims=True))   # exact reciprocal
    o = jnp.dot(p, v, preferred_element_type=jnp.float32)
    o_ref[...] = o.astype(o_ref.dtype)


# ---------------------------------------------------------------------------
# generic row-tiled pallas_call wrapper
# ---------------------------------------------------------------------------
def _round_up(x, m):
    return ((x + m - 1) // m) * m


def _row_tile(m, target):
    # MXU-friendly row tile: multiple of 8, at most the (8-rounded) row count.
    return max(8, min(_round_up(target, 8), _round_up(m, 8)))


def _rowwise_pallas(kernel, row_arrays, const_arrays, out_cols, out_dtype,
                    *, tm_target=256, extra_f32_cols=0):
    """Run `kernel(*row_refs, *const_refs, o_ref)` over MXU-aligned row tiles.

    row_arrays:   2-D (M, D_i) arrays tiled along rows (double-buffered).
    const_arrays: 2-D arrays resident across all grid steps (single-buffered).
    """
    M = row_arrays[0].shape[0]
    tm = _row_tile(M, tm_target)
    Mp = _round_up(M, tm)
    padded = [jnp.pad(a, ((0, Mp - M), (0, 0))) if Mp != M else a
              for a in row_arrays]
    grid = (Mp // tm,)

    row_specs = [pl.BlockSpec((tm, a.shape[1]), lambda i: (i, 0)) for a in padded]

    # Explicit VMEM budget: double-buffered row tiles + output tile, resident
    # weights (worst-case 2x for the fallback path), in-kernel f32
    # intermediates, plus compiler headroom.  Capped at 64 MiB (v7x physical).
    vmem = 4 << 20
    for a in padded:
        vmem += 2 * tm * a.shape[1] * a.dtype.itemsize
    vmem += 2 * tm * out_cols * np.dtype(out_dtype).itemsize
    for c in const_arrays:
        vmem += 2 * int(c.size) * c.dtype.itemsize
    vmem += tm * (out_cols + extra_f32_cols) * 4
    vmem = int(min(max(vmem, 16 << 20), 64 << 20))

    def call(single_buffer_consts):
        if single_buffer_consts:
            # Constant index_map => the block never changes; single-buffer it.
            const_specs = [pl.BlockSpec(c.shape, lambda i: (0, 0),
                                        pipeline_mode=pl.Buffered(1))
                           for c in const_arrays]
        else:
            const_specs = [pl.BlockSpec(c.shape, lambda i: (0, 0))
                           for c in const_arrays]
        return pl.pallas_call(
            kernel,
            out_shape=jax.ShapeDtypeStruct((Mp, out_cols), out_dtype),
            grid_spec=pltpu.PrefetchScalarGridSpec(
                num_scalar_prefetch=0,
                grid=grid,
                in_specs=row_specs + const_specs,
                out_specs=pl.BlockSpec((tm, out_cols), lambda i: (i, 0)),
            ),
            compiler_params=pltpu.CompilerParams(
                dimension_semantics=("parallel",),
                vmem_limit_bytes=vmem),
        )(*padded, *const_arrays)

    try:
        out = call(single_buffer_consts=True)
    except Exception:
        # Fallback for jax builds that reject pipeline_mode / Buffered(1):
        # default double-buffered resident weights (still correct).
        out = call(single_buffer_consts=False)

    return out[:M] if Mp != M else out


def _attention_core(q, k, v, scale):
    """q,k,v: (B*num_heads, S, head_dim) -> same shape."""
    BH, S, D = q.shape
    vmem = 2 * (4 * S * D * q.dtype.itemsize) + 2 * S * S * 4 + (4 << 20)
    vmem = int(min(max(vmem, 16 << 20), 64 << 20))
    kernel = functools.partial(_attn_core_kernel, scale=scale)
    spec = pl.BlockSpec((None, S, D), lambda i: (i, 0, 0))   # leading dim squeezed
    return pl.pallas_call(
        kernel,
        out_shape=jax.ShapeDtypeStruct((BH, S, D), q.dtype),
        grid_spec=pltpu.PrefetchScalarGridSpec(
            num_scalar_prefetch=0,
            grid=(BH,),
            in_specs=[spec, spec, spec],
            out_specs=pl.BlockSpec((None, S, D), lambda i: (i, 0, 0)),
        ),
        compiler_params=pltpu.CompilerParams(
            dimension_semantics=("parallel",),
            vmem_limit_bytes=vmem),
    )(q, k, v)


# ---------------------------------------------------------------------------
# ViT forward (Pallas) and parameter init
# ---------------------------------------------------------------------------
def _transformer_block(x, p, num_heads):
    B, S, E = x.shape
    hd = E // num_heads
    M = B * S
    x2d = x.reshape(M, E)

    # ---- attention branch: qkv = LN1(x) @ Wqkv + bqkv (LN fused into matmul) ----
    qkv = _rowwise_pallas(_ln_linear_kernel, [x2d],
                          [p["ln1_g"], p["ln1_b"], p["wqkv"], p["bqkv"]],
                          out_cols=3 * E, out_dtype=x.dtype,
                          extra_f32_cols=2 * E)
    qkv = qkv.reshape(B, S, 3, num_heads, hd)
    q = qkv[:, :, 0].transpose(0, 2, 1, 3).reshape(B * num_heads, S, hd)
    k = qkv[:, :, 1].transpose(0, 2, 1, 3).reshape(B * num_heads, S, hd)
    v = qkv[:, :, 2].transpose(0, 2, 1, 3).reshape(B * num_heads, S, hd)

    attn = _attention_core(q, k, v, scale=float(hd) ** -0.5)
    attn2d = attn.reshape(B, num_heads, S, hd).transpose(0, 2, 1, 3).reshape(M, E)

    # ---- output projection + residual (fused) ----
    x2d = _rowwise_pallas(_linear_residual_kernel, [attn2d, x2d],
                          [p["wo"], p["bo"]],
                          out_cols=E, out_dtype=x.dtype,
                          extra_f32_cols=E)

    # ---- MLP branch: x + fc2(gelu(fc1(LN2(x)))) fused into one kernel ----
    H = p["w1"].shape[1]
    x2d = _rowwise_pallas(_ffn_block_kernel, [x2d],
                          [p["ln2_g"], p["ln2_b"],
                           p["w1"], p["b1"], p["w2"], p["b2"]],
                          out_cols=E, out_dtype=x.dtype,
                          extra_f32_cols=2 * H + 2 * E)

    return x2d.reshape(B, S, E)


def vit_forward(img, params, cfg):
    """Pallas ViT forward:  img (B, C, H, W) -> logits (B, num_classes)."""
    B, C, Hs, Ws = img.shape
    P, E, nH = cfg["patch_size"], cfg["embed_dim"], cfg["num_heads"]
    gh, gw = Hs // P, Ws // P
    N = gh * gw

    # Conv2d(kernel=stride=P) == per-patch linear projection (conv-as-matmul).
    patches = img.reshape(B, C, gh, P, gw, P).transpose(0, 2, 4, 1, 3, 5)
    patches = patches.reshape(B * N, C * P * P)
    x2d = _rowwise_pallas(_linear_kernel, [patches],
                          [params["w_patch"], params["b_patch"]],
                          out_cols=E, out_dtype=img.dtype,
                          extra_f32_cols=E)
    x = x2d.reshape(B, N, E)

    # cls token + positional embedding (pure data plumbing in XLA).
    cls = jnp.broadcast_to(params["cls_token"], (B, 1, E)).astype(x.dtype)
    x = jnp.concatenate([cls, x], axis=1) + params["pos_emb"].astype(x.dtype)

    for p in params["blocks"]:
        x = _transformer_block(x, p, cfg["num_heads"])

    cls_out = x[:, 0]                                           # (B, E)
    logits = _rowwise_pallas(_linear_kernel, [cls_out],
                             [params["w_head"], params["b_head"]],
                             out_cols=cfg["num_classes"], out_dtype=x.dtype,
                             extra_f32_cols=cfg["num_classes"])
    return logits


def init_vit_params(key, cfg, dtype=jnp.float32):
    """nn.Linear-style uniform(+-1/sqrt(fan_in)) init; LN gamma=1, beta=0.
    cls/pos params are small randoms (PyTorch zero-inits them; random values
    exercise the concat/add paths). Weights stored as (in, out)."""
    E, H = cfg["embed_dim"], cfg["hidden_dim"]
    C, P = cfg["in_channels"], cfg["patch_size"]
    N = (cfg["img_size"] // P) ** 2

    def linear(k, fan_in, fan_out):
        kw, kb = jax.random.split(k)
        bound = float(fan_in) ** -0.5
        w = jax.random.uniform(kw, (fan_in, fan_out), dtype, -bound, bound)
        b = jax.random.uniform(kb, (1, fan_out), dtype, -bound, bound)
        return w, b

    keys = jax.random.split(key, 4 + cfg["num_layers"])
    w_patch, b_patch = linear(keys[0], C * P * P, E)
    w_head, b_head = linear(keys[1], E, cfg["num_classes"])
    cls_token = 0.02 * jax.random.normal(keys[2], (1, 1, E), dtype)
    pos_emb = 0.02 * jax.random.normal(keys[3], (1, N + 1, E), dtype)

    blocks = []
    for i in range(cfg["num_layers"]):
        bk = jax.random.split(keys[4 + i], 4)
        wqkv, bqkv = linear(bk[0], E, 3 * E)
        wo, bo = linear(bk[1], E, E)
        w1, b1 = linear(bk[2], E, H)
        w2, b2 = linear(bk[3], H, E)
        blocks.append(dict(
            ln1_g=jnp.ones((1, E), dtype), ln1_b=jnp.zeros((1, E), dtype),
            ln2_g=jnp.ones((1, E), dtype), ln2_b=jnp.zeros((1, E), dtype),
            wqkv=wqkv, bqkv=bqkv, wo=wo, bo=bo,
            w1=w1, b1=b1, w2=w2, b2=b2))

    return dict(w_patch=w_patch, b_patch=b_patch, cls_token=cls_token,
                pos_emb=pos_emb, blocks=blocks, w_head=w_head, b_head=b_head)


# ---------------------------------------------------------------------------
# pure-JAX reference (mirrors the PyTorch VisionTransformer forward)
# ---------------------------------------------------------------------------
def _layernorm_ref(x, g, b):
    mu = x.mean(-1, keepdims=True)
    var = ((x - mu) ** 2).mean(-1, keepdims=True)
    return (x - mu) / jnp.sqrt(var + _LN_EPS) * g + b


def vit_reference(img, params, cfg):
    B, C, Hs, Ws = img.shape
    P, E, nH = cfg["patch_size"], cfg["embed_dim"], cfg["num_heads"]
    gh, gw = Hs // P, Ws // P
    hd = E // nH

    patches = img.reshape(B, C, gh, P, gw, P).transpose(0, 2, 4, 1, 3, 5)
    patches = patches.reshape(B, gh * gw, C * P * P)
    x = patches @ params["w_patch"] + params["b_patch"]
    cls = jnp.broadcast_to(params["cls_token"], (B, 1, E))
    x = jnp.concatenate([cls, x], axis=1) + params["pos_emb"]

    for p in params["blocks"]:
        S = x.shape[1]
        h = _layernorm_ref(x, p["ln1_g"], p["ln1_b"])
        qkv = (h @ p["wqkv"] + p["bqkv"]).reshape(B, S, 3, nH, hd)
        qkv = qkv.transpose(2, 0, 3, 1, 4)
        q, k, v = qkv[0], qkv[1], qkv[2]
        attn = jax.nn.softmax(jnp.einsum("bhqd,bhkd->bhqk", q, k) * hd ** -0.5,
                              axis=-1)
        out = jnp.einsum("bhqk,bhkd->bhqd", attn, v)
        out = out.transpose(0, 2, 1, 3).reshape(B, S, E)
        x = x + out @ p["wo"] + p["bo"]
        h = _layernorm_ref(x, p["ln2_g"], p["ln2_b"])
        x = x + jax.nn.gelu(h @ p["w1"] + p["b1"],
                            approximate=False) @ p["w2"] + p["b2"]

    return x[:, 0] @ params["w_head"] + params["b_head"]


# ---------------------------------------------------------------------------
if __name__ == "__main__":
    # Keep reference matmuls in full f32 so the check against the
    # f32-accumulating Pallas kernels is tight.
    jax.config.update("jax_default_matmul_precision", "highest")

    cfg = dict(img_size=16, in_channels=4, patch_size=4, embed_dim=32,
               num_heads=4, num_layers=2, hidden_dim=64, num_classes=10)

    key = jax.random.PRNGKey(0)
    kx, kp = jax.random.split(key)
    img = jax.random.normal(
        kx, (2, cfg["in_channels"], cfg["img_size"], cfg["img_size"]),
        dtype=jnp.float32)
    params = init_vit_params(kp, cfg, dtype=jnp.float32)

    logits = vit_forward(img, params, cfg)
    logits = jax.block_until_ready(logits)

    ref = vit_reference(img, params, cfg)
    assert logits.shape == (2, cfg["num_classes"])
    err = float(jnp.max(jnp.abs(logits - ref)))
    assert jnp.allclose(logits, ref, atol=5e-4, rtol=5e-4), f"max abs err {err}"

    print("KERNEL_OK")
</pallas_src>

<mosaic_0001>
module attributes {stable_mosaic.version = 11 : i64} {
  func.func @_linear_kernel(%arg0: i32, %arg1: memref<32x64xf32, #tpu.memory_space<vmem>>, %arg2: memref<64x32xf32, #tpu.memory_space<vmem>>, %arg3: memref<1x32xf32, #tpu.memory_space<vmem>>, %arg4: memref<32x32xf32, #tpu.memory_space<vmem>>) attributes {dimension_semantics = [#tpu.dimension_semantics<parallel>], iteration_bounds = array<i64: 1>, scalar_prefetch = 0 : i64, scratch_operands = 0 : i64, tpu.core_type = #tpu.core_type<tc>, window_params = [{transform_indices = @transform_0, window_bounds = array<i64: 32, 64>}, {pipeline_mode = #tpu.pipeline_mode<synchronous>, transform_indices = @transform_1, window_bounds = array<i64: 64, 32>}, {pipeline_mode = #tpu.pipeline_mode<synchronous>, transform_indices = @transform_2, window_bounds = array<i64: 1, 32>}, {transform_indices = @transform_3, window_bounds = array<i64: 32, 32>}]} {
    %c0 = arith.constant 0 : index
    %c0_0 = arith.constant 0 : index
    %0 = vector.load %arg1[%c0, %c0_0] : memref<32x64xf32, #tpu.memory_space<vmem>>, vector<32x64xf32>
    %c0_1 = arith.constant 0 : index
    %c0_2 = arith.constant 0 : index
    %1 = vector.load %arg2[%c0_1, %c0_2] : memref<64x32xf32, #tpu.memory_space<vmem>>, vector<64x32xf32>
    %cst = arith.constant dense<0.000000e+00> : vector<32x32xf32>
    %2 = tpu.matmul %0, %1, %cst {dimension_numbers = #tpu.dot_dimension_numbers<[1], [0], [0], [1], [0, 0, 1, 1], [], []>, precision = #tpu.contract_precision<fp32>} : vector<32x64xf32>, vector<64x32xf32>, vector<32x32xf32> -> vector<32x32xf32>
    %c0_3 = arith.constant 0 : index
    %c0_4 = arith.constant 0 : index
    %3 = vector.load %arg3[%c0_3, %c0_4] : memref<1x32xf32, #tpu.memory_space<vmem>>, vector<1x32xf32>
    %4 = vector.broadcast %3 : vector<1x32xf32> to vector<32x32xf32>
    %5 = arith.addf %2, %4 : vector<32x32xf32>
    %c0_5 = arith.constant 0 : index
    %c0_6 = arith.constant 0 : index
    %6 = vector.load %arg4[%c0_5, %c0_6] : memref<32x32xf32, #tpu.memory_space<vmem>>, vector<32x32xf32>
    tpu.vector_store %arg4[%c0_5, %c0_6], %5 {strides = array<i32>} : memref<32x32xf32, #tpu.memory_space<vmem>>, vector<32x32xf32>,
    return
  }
  func.func @transform_0(%arg0: i32) -> (i32, i32) {
    %c0_i32 = arith.constant 0 : i32
    %c0_i32_0 = arith.constant 0 : i32
    return %arg0, %c0_i32 : i32, i32
  }
  func.func @transform_1(%arg0: i32) -> (i32, i32) {
    %c0_i32 = arith.constant 0 : i32
    %c0_i32_0 = arith.constant 0 : i32
    %c0_i32_1 = arith.constant 0 : i32
    return %c0_i32, %c0_i32_0 : i32, i32
  }
  func.func @transform_2(%arg0: i32) -> (i32, i32) {
    %c0_i32 = arith.constant 0 : i32
    %c0_i32_0 = arith.constant 0 : i32
    %c0_i32_1 = arith.constant 0 : i32
    return %c0_i32, %c0_i32_0 : i32, i32
  }
  func.func @transform_3(%arg0: i32) -> (i32, i32) {
    %c0_i32 = arith.constant 0 : i32
    %c0_i32_0 = arith.constant 0 : i32
    return %arg0, %c0_i32 : i32, i32
  }
}

module attributes {stable_mosaic.version = 11 : i64} {
  func.func @_linear_kernel(%arg0: i32, %arg1: memref<32x64xf32, #tpu.memory_space<vmem>>, %arg2: memref<64x32xf32, #tpu.memory_space<vmem>>, %arg3: memref<1x32xf32, #tpu.memory_space<vmem>>, %arg4: memref<32x32xf32, #tpu.memory_space<vmem>>) attributes {dimension_semantics = [#tpu.dimension_semantics<parallel>], iteration_bounds = array<i64: 1>, scalar_prefetch = 0 : i64, scratch_operands = 0 : i64, tpu.core_type = #tpu.core_type<tc>, window_params = [{transform_indices = @transform_0, window_bounds = array<i64: 32, 64>}, {pipeline_mode = #tpu.pipeline_mode<synchronous>, transform_indices = @transform_1, window_bounds = array<i64: 64, 32>}, {pipeline_mode = #tpu.pipeline_mode<synchronous>, transform_indices = @transform_2, window_bounds = array<i64: 1, 32>}, {transform_indices = @transform_3, window_bounds = array<i64: 32, 32>}]} {
    %c0 = arith.constant 0 : index
    %c0_0 = arith.constant 0 : index
    %0 = vector.load %arg1[%c0, %c0_0] : memref<32x64xf32, #tpu.memory_space<vmem>>, vector<32x64xf32>
    %c0_1 = arith.constant 0 : index
    %c0_2 = arith.constant 0 : index
    %1 = vector.load %arg2[%c0_1, %c0_2] : memref<64x32xf32, #tpu.memory_space<vmem>>, vector<64x32xf32>
    %cst = arith.constant dense<0.000000e+00> : vector<32x32xf32>
    %2 = tpu.matmul %0, %1, %cst {dimension_numbers = #tpu.dot_dimension_numbers<[1], [0], [0], [1], [0, 0, 1, 1], [], []>, precision = #tpu.contract_precision<fp32>} : vector<32x64xf32>, vector<64x32xf32>, vector<32x32xf32> -> vector<32x32xf32>
    %c0_3 = arith.constant 0 : index
    %c0_4 = arith.constant 0 : index
    %3 = vector.load %arg3[%c0_3, %c0_4] : memref<1x32xf32, #tpu.memory_space<vmem>>, vector<1x32xf32>
    %4 = vector.broadcast %3 : vector<1x32xf32> to vector<32x32xf32>
    %5 = arith.addf %2, %4 : vector<32x32xf32>
    %c0_5 = arith.constant 0 : index
    %c0_6 = arith.constant 0 : index
    %6 = vector.load %arg4[%c0_5, %c0_6] : memref<32x32xf32, #tpu.memory_space<vmem>>, vector<32x32xf32>
    tpu.vector_store %arg4[%c0_5, %c0_6], %5 {strides = array<i32>} : memref<32x32xf32, #tpu.memory_space<vmem>>, vector<32x32xf32>,
    return
  }
  func.func @transform_0(%arg0: i32) -> (i32, i32) {
    %c0_i32 = arith.constant 0 : i32
    %c0_i32_0 = arith.constant 0 : i32
    return %arg0, %c0_i32 : i32, i32
  }
  func.func @transform_1(%arg0: i32) -> (i32, i32) {
    %c0_i32 = arith.constant 0 : i32
    %c0_i32_0 = arith.constant 0 : i32
    %c0_i32_1 = arith.constant 0 : i32
    return %c0_i32, %c0_i32_0 : i32, i32
  }
  func.func @transform_2(%arg0: i32) -> (i32, i32) {
    %c0_i32 = arith.constant 0 : i32
    %c0_i32_0 = arith.constant 0 : i32
    %c0_i32_1 = arith.constant 0 : i32
    return %c0_i32, %c0_i32_0 : i32, i32
  }
  func.func @transform_3(%arg0: i32) -> (i32, i32) {
    %c0_i32 = arith.constant 0 : i32
    %c0_i32_0 = arith.constant 0 : i32
    return %arg0, %c0_i32 : i32, i32
  }
}

</mosaic_0001>

<bundles_post_ra>
// kernel: tpu_custom_call.1
= control target key start
LH: loop header
LB: loop body
LE: loop exit
PB: predicated region body
PF: predicated region fallthrough
CT: control target
= control target key end

     0   :  { %vm34_vm0 = vcmask 523264   ;;  %s1288_s0 = inlined_call_operand.vmem [shape: f32[32,64], index: 0, kind: input, shape index: {}]   ;;  %s1289_s1 = inlined_call_operand.vmem [shape: f32[64,32], index: 1, kind: input, shape index: {}]   ;;  %s1290_s2 = inlined_call_operand.vmem [shape: f32[1,32], index: 2, kind: input, shape index: {}]   ;;  %s1291_s3 = inlined_call_operand.hbm [shape: f32[32,32], index: 3, kind: output, shape index: {}]  }
   0x1   :  { %v19_v0 = vld [vmem:[%s1289_s1] sm:$0xff]  ;;  %v20_v1 = vld [vmem:[%s1289_s1 + $0x8] sm:$0xff]  ;;  %v21_v2 = vld [vmem:[%s1289_s1 + $0x10] sm:$0xff] }
   0x2   :  { %v48_v3 = vand.u32 4294901760, %v19_v0  ;;  %v51_v4 = vand.u32 4294901760, %v20_v1  ;;  %v22_v5 = vld [vmem:[%s1289_s1 + $0x18] sm:$0xff]  ;;  %v54_v6 = vand.u32 4294901760, %v21_v2  ;;  %v23_v7 = vld [vmem:[%s1289_s1 + $0x20] sm:$0xff]  ;;  %v24_v8 = vld [vmem:[%s1289_s1 + $0x28] sm:$0xff] }
   0x3   :  { %v57_v9 = vand.u32 4294901760, %v22_v5  ;;  %v60_v10 = vand.u32 4294901760, %v23_v7  ;;  %v63_v11 = vand.u32 4294901760, %v24_v8  ;;  %v25_v12 = vld [vmem:[%s1289_s1 + $0x30] sm:$0xff]  ;;  %v1133_v13 = vld [vmem:[%s1289_s1 + $0x38] sm:$0xff]  ;;  %v15_v14 = vld [vmem:[%s1288_s0] sm:$0xff] }
   0x4   :  { %v1138_v15 = vpack.c.bf16 %v51_v4, %v48_v3  ;;  %v66_v16 = vand.u32 4294901760, %v25_v12  ;;  %v36_v17 = vsel %vm34_vm0, %v15_v14, 0  ;;  %v16_v18 = vld [vmem:[%s1288_s0 + $0x8] sm:$0xff]  ;;  %v69_v20 = vand.u32 4294901760, %v1133_v13 }
   0x5   :  { %v1144_v19 = vpack.c.bf16 %v57_v9, %v54_v6  ;;  %v1147_v21 = vand.u32 4294901760, %v36_v17  ;;  %v1149_v22 = vsub.f32 %v19_v0, %v48_v3 }
   0x6   :  { %8 = vsyncpa [#allocation3], 0  ;;  %940 = vmatprep.subr.bf16.mxu1 %v1138_v15  ;;  %988 = vmatprep.subr.bf16.mxu0 %v1138_v15  ;;  %v1153_v23 = vpack.c.bf16 %v63_v11, %v60_v10  ;;  %v1155_v24 = vsub.f32 %v20_v1, %v51_v4  ;;  %v39_v25 = vsel %vm34_vm0, %v16_v18, 0  ;;  %v1158_v26 = vsub.f32 %v21_v2, %v54_v6  ;;  %v17_v46 = vld [vmem:[%s1288_s0 + $0x10] sm:$0xff]  ;;  %v18_v52 = vld [vmem:[%s1288_s0 + $0x18] sm:$0xff]  ;;  %s1086_s9 = smov [#allocation2]  }
   0x7   :  { %942 = vmatpush3.bf16.msra.mxu1 %v1138_v15  ;;  %990 = vmatpush3.bf16.msra.mxu0 %v1138_v15  ;;  %v1163_v27 = vsub.f32 %v36_v17, %v1147_v21  ;;  %v163_v28 = vand.u32 4294901760, %v1149_v22  ;;  %v1166_v29 = vand.u32 4294901760, %v39_v25  ;;  %v1168_v30 = vsub.f32 %v22_v5, %v57_v9  ;;  %s723_s10 = sshll.u32 %s1086_s9, 4  ;;  %s724_s10 = int_to_ptr.vmem [resolvable:$true] %s723_s10 }
   0x8   :  { %944 = vmatprep.subr.bf16.mxu1 %v1144_v19  ;;  %992 = vmatprep.subr.bf16.mxu0 %v1144_v19  ;;  %v170_v31 = vand.u32 4294901760, %v1155_v24  ;;  %v177_v32 = vand.u32 4294901760, %v1158_v26  ;;  %v1174_v33 = vsub.f32 %v23_v7, %v60_v10  ;;  %v1176_v34 = vsub.f32 %v24_v8, %v63_v11  ;;  %p1067_p1 = scmp.lt.s32.totalorder %s724_s10, %s724_s10 }
   0x9   :  { %v122_v35 = vand.u32 4294901760, %v1163_v27  ;;  %v164_v36 = vsub.f32 %v1149_v22, %v163_v28  ;;  %v1181_v37 = vsub.f32 %v39_v25, %v1166_v29  ;;  %v184_v38 = vand.u32 4294901760, %v1168_v30 }
   0xa   :  { %v171_v39 = vsub.f32 %v1155_v24, %v170_v31  ;;  %v178_v40 = vsub.f32 %v1158_v26, %v177_v32  ;;  %v191_v41 = vand.u32 4294901760, %v1174_v33  ;;  %v1197_v47 = vpack.c.bf16 %v69_v20, %v66_v16 }
   0xb   :  { %946 = vmatpush3.bf16.msra.mxu1 %v1144_v19  ;;  %994 = vmatpush3.bf16.msra.mxu0 %v1144_v19  ;;  %v123_v42 = vsub.f32 %v1163_v27, %v122_v35  ;;  %v165_v43 = vand.u32 4294901760, %v164_v36  ;;  %v132_v44 = vand.u32 4294901760, %v1181_v37  ;;  %v185_v45 = vsub.f32 %v1168_v30, %v184_v38 }
   0xc   :  { %948 = vmatprep.subr.bf16.mxu1 %v1153_v23  ;;  %996 = vmatprep.subr.bf16.mxu0 %v1153_v23  ;;  %v172_v48 = vand.u32 4294901760, %v171_v39  ;;  %v1003_v50 = vpack.c.bf16 %v170_v31, %v163_v28  ;;  %v198_v51 = vand.u32 4294901760, %v1176_v34  ;;  %v179_v54 = vand.u32 4294901760, %v178_v40 }
   0xd   :  { %v124_v49 = vand.u32 4294901760, %v123_v42  ;;  %889 = vmatprep.mubr.f32.mxu0 %v122_v35  ;;  %v133_v53 = vsub.f32 %v1181_v37, %v132_v44  ;;  %v42_v55 = vsel %vm34_vm0, %v17_v46, 0  ;;  %v1205_v56 = vsub.f32 %v25_v12, %v66_v16 }
   0xe   :  { %v955_v57 = vpack.c.bf16 %v172_v48, %v165_v43  ;;  %v186_v58 = vand.u32 4294901760, %v185_v45  ;;  %v192_v59 = vsub.f32 %v1174_v33, %v191_v41  ;;  %v199_v60 = vsub.f32 %v1176_v34, %v198_v51 }
   0xf   :  { %950 = vmatpush3.bf16.msra.mxu1 %v1153_v23  ;;  %998 = vmatpush3.bf16.msra.mxu0 %v1153_v23  ;;  %v1213_v61 = vand.u32 4294901760, %v42_v55  ;;  %v205_v62 = vand.u32 4294901760, %v1205_v56  ;;  %v1217_v63 = vsub.f32 %v1133_v13, %v69_v20  ;;  %v45_v0 = vsel %vm34_vm0, %v18_v52, 0 }
  0x10   :  { %952 = vmatprep.subr.bf16.mxu1 %v1197_v47  ;;  %1000 = vmatprep.subr.bf16.mxu0 %v1197_v47  ;;  %v1220_v1 = vand.u32 4294901760, %v45_v0  ;;  %v134_v2 = vand.u32 4294901760, %v133_v53  ;;  %v959_v5 = vpack.c.bf16 %v186_v58, %v179_v54  ;;  %v1007_v6 = vpack.c.bf16 %v184_v38, %v177_v32 }
  0x11   :  { %823 = vmatprep.mubr.f32.mxu1 %v124_v49  ;;  %v1223_v3 = vsub.f32 %v42_v55, %v1213_v61  ;;  %v212_v4 = vand.u32 4294901760, %v1217_v63  ;;  %v193_v7 = vand.u32 4294901760, %v192_v59  ;;  %v200_v9 = vand.u32 4294901760, %v199_v60 }
  0x12   :  { %v1229_v8 = vsub.f32 %v45_v0, %v1220_v1  ;;  %v206_v11 = vsub.f32 %v1205_v56, %v205_v62  ;;  %v1011_v16 = vpack.c.bf16 %v198_v51, %v191_v41  ;;  %v971_v36 = vpack.c.bf16 %v1155_v24, %v1149_v22 }
  0x13   :  { %954 = vmatpush3.bf16.msra.mxu1 %v1197_v47  ;;  %1002 = vmatpush3.bf16.msra.mxu0 %v1197_v47  ;;  %v142_v10 = vand.u32 4294901760, %v1223_v3  ;;  %v213_v12 = vsub.f32 %v1217_v63, %v212_v4  ;;  %v963_v18 = vpack.c.bf16 %v200_v9, %v193_v7  ;;  %v1015_v35 = vpack.c.bf16 %v212_v4, %v205_v62 }
  0x14   :  { %956 = vmatprep.subr.bf16.mxu1 %v955_v57  ;;  %1004 = vmatprep.subr.bf16.mxu0 %v1003_v50  ;;  %v152_v13 = vand.u32 4294901760, %v1229_v8  ;;  %v207_v25 = vand.u32 4294901760, %v206_v11  ;;  %v975_v38 = vpack.c.bf16 %v1168_v30, %v1158_v26  ;;  %v979_v22 = vpack.c.bf16 %v1176_v34, %v1174_v33 }
  0x15   :  { %v143_v14 = vsub.f32 %v1223_v3, %v142_v10  ;;  %v214_v28 = vand.u32 4294901760, %v213_v12  ;;  %vm713_vm1 = vcmask 261120  }
  0x16   :  { %824 = vmatmul.mubr.f32.vlgmr.msra.gmra.mrb[0].mxu1 %v134_v2  ;;  %890 = vmatmul.mubr.f32.vlgmr.msra.gmra.mrb[0].mxu0 %v132_v44  ;;  %v153_v17 = vsub.f32 %v1229_v8, %v152_v13 }
  0x17   :  { %958 = vmatpush3.bf16.msra.mxu1 %v955_v57  ;;  %1006 = vmatpush3.bf16.msra.mxu0 %v1003_v50  ;;  %v144_v20 = vand.u32 4294901760, %v143_v14  ;;  %v967_v32 = vpack.c.bf16 %v214_v28, %v207_v25 }
  0x18   :  { %960 = vmatprep.subr.bf16.mxu1 %v959_v5  ;;  %1008 = vmatprep.subr.bf16.mxu0 %v1007_v6  ;;  %v154_v31 = vand.u32 4294901760, %v153_v17 }
  0x19   :  { %892 = vmatprep.mubr.f32.mxu0 %v142_v10  ;;  %826 = vmatprep.mubr.f32.mxu1 %v144_v20 }
  0x1a   :  { %893 = vmatmul.mubr.f32.gmra.mrb[2].mxu0 %v152_v13  ;;  %827 = vmatmul.mubr.f32.gmra.mrb[2].mxu1 %v154_v31 }
  0x1b   :  { %962 = vmatpush3.bf16.msra.mxu1 %v959_v5  ;;  %1010 = vmatpush3.bf16.msra.mxu0 %v1007_v6 }
  0x1c   :  { %964 = vmatprep.subr.bf16.mxu1 %v963_v18  ;;  %1012 = vmatprep.subr.bf16.mxu0 %v1011_v16 }
  0x1d   :  { %911 = vmatprep.mubr.f32.mxu0 %v1147_v21  ;;  %845 = vmatprep.mubr.f32.mxu1 %v1147_v21 }
  0x1f   :  { %966 = vmatpush3.bf16.msra.mxu1 %v963_v18  ;;  %1014 = vmatpush3.bf16.msra.mxu0 %v1011_v16 }
  0x20   :  { %968 = vmatprep.subr.bf16.mxu1 %v967_v32  ;;  %1016 = vmatprep.subr.bf16.mxu0 %v1015_v35 }
  0x23   :  { %970 = vmatpush3.bf16.msra.mxu1 %v967_v32  ;;  %1018 = vmatpush3.bf16.msra.mxu0 %v1015_v35 }
  0x24   :  { %972 = vmatprep.subr.bf16.mxu1 %v971_v36  ;;  %1020 = vmatprep.subr.bf16.mxu0 %v1138_v15 }
  0x26   :  { %846 = vmatmul.mubr.f32.vlgmr.msra.gmra.mrb[0].mxu1 %v1166_v29  ;;  %912 = vmatmul.mubr.f32.vlgmr.msra.gmra.mrb[0].mxu0 %v1166_v29 }
  0x27   :  { %974 = vmatpush3.bf16.msra.mxu1 %v971_v36  ;;  %1022 = vmatpush3.bf16.msra.mxu0 %v1138_v15  ;;  %v983_v15 = vpack.c.bf16 %v1217_v63, %v1205_v56 }
  0x28   :  { %976 = vmatprep.subr.bf16.mxu1 %v975_v38  ;;  %1024 = vmatprep.subr.bf16.mxu0 %v1144_v19 }
  0x29   :  { %848 = vmatprep.mubr.f32.mxu1 %v1213_v61  ;;  %914 = vmatprep.mubr.f32.mxu0 %v1213_v61 }
  0x2a   :  { %849 = vmatmul.mubr.f32.gmra.mrb[2].mxu1 %v1220_v1  ;;  %915 = vmatmul.mubr.f32.gmra.mrb[2].mxu0 %v1220_v1 }
  0x2b   :  { %978 = vmatpush3.bf16.msra.mxu1 %v975_v38  ;;  %1026 = vmatpush3.bf16.msra.mxu0 %v1144_v19  ;;  %v734_v19 = vld [vmem:[%s1290_s2] ss:$0 sm:$0xff]  ;;  %s1062_s2 = scalar_lea.vmem %s724_s10, 512 }
  0x2c   :  { %980 = vmatprep.subr.bf16.mxu1 %v979_v22  ;;  %1028 = vmatprep.subr.bf16.mxu0 %v1153_v23  ;;  %p1063_p0 = scmp.ne.s32.totalorder %s724_s10, %s1062_s2  ;;  %p1068_p2 = scmp.lt.s32.totalorder %s1062_s2, %s1062_s2 }
  0x2d   :  { %867 = vmatprep.mubr.f32.mxu1 %v1163_v27  ;;  %933 = vmatprep.mubr.f32.mxu0 %v1147_v21 }
  0x2e   :  { %p1069_p3 = por %p1068_p2, %p1067_p1 }
  0x2f   :  { %982 = vmatpush3.bf16.msra.mxu1 %v979_v22  ;;  %1030 = vmatpush3.bf16.msra.mxu0 %v1153_v23 }
  0x30   :  { %984 = vmatprep.subr.bf16.mxu1 %v983_v15  ;;  %1032 = vmatprep.subr.bf16.mxu0 %v1197_v47  ;;  %p1070_p4 = pnand %p1069_p3, %p1063_p0 }
  0x33   :  { %986 = vmatpush3.bf16.msra.mxu1 %v983_v15  ;;  %1034 = vmatpush3.bf16.msra.mxu0 %v1197_v47 }
  0x36   :  { %868 = vmatmul.mubr.f32.vlgmr.msra.gmra.mrb[0].mxu1 %v1181_v37  ;;  %934 = vmatmul.mubr.f32.vlgmr.msra.gmra.mrb[0].mxu0 %v1166_v29 }
  0x37   :  { %870 = vmatprep.mubr.f32.mxu1 %v1223_v3  ;;  %936 = vmatprep.mubr.f32.mxu0 %v1213_v61 }
  0x3a   :  { %871 = vmatmul.mubr.f32.gmra.mrb[2].mxu1 %v1229_v8  ;;  %937 = vmatmul.mubr.f32.gmra.mrb[2].mxu0 %v1220_v1 }
 0x109   :  { %v869_v21 = vpop.f32.mrb[0].mxu1  ;;  %v935_v23 = vpop.f32.mrb[0].mxu0 }
 0x10a   :  { %v1035_v24 = vadd.f32 %v869_v21, %v734_v19  ;;  %v373_v26 = vpop.f32.mrb[1].mxu1  ;;  %v691_v27 = vpop.f32.mrb[1].mxu0 }
 0x10b   :  { %v1037_v30 = vadd.f32 %v734_v19, %v373_v26 }
 0x10c   :  { %v1036_v29 = vadd.f32 %v1035_v24, %v935_v23 }
 0x10d   :  { %v1038_v33 = vadd.f32 %v1037_v30, %v691_v27  ;;  %v872_v34 = vpop.f32.mrb[2].mxu1  ;;  %v938_v37 = vpop.f32.mrb[2].mxu0 }
 0x10e   :  { %715 = vst.msk [vmem:[#allocation2 + $0x8] sm:$0xff] %vm713_vm1, %v1036_v29  ;;  %v1039_v39 = vadd.f32 %v872_v34, %v734_v19  ;;  %v387_v40 = vpop.f32.mrb[3].mxu1  ;;  %v703_v41 = vpop.f32.mrb[3].mxu0 }
 0x10f   :  { %714 = vst.msk [vmem:[#allocation2] sm:$0xff] %vm713_vm1, %v1038_v33  ;;  %v1041_v42 = vadd.f32 %v734_v19, %v387_v40 }
 0x110   :  { %v1040_v43 = vadd.f32 %v1039_v39, %v938_v37 }
 0x111   :  { %v1042_v44 = vadd.f32 %v1041_v42, %v703_v41 }
 0x112   :  { %717 = vst.msk [vmem:[#allocation2 + $0x18] sm:$0xff] %vm713_vm1, %v1040_v43 }
 0x113   :  { %716 = vst.msk [vmem:[#allocation2 + $0x10] sm:$0xff] %vm713_vm1, %v1042_v44 }
 0x114   :  { %1073 = shalt.err (!%p1070_p4)
}
 0x115   :  { %s1074_s13 = scalar_lea.hbm %s1291_s3, 512 }
 0x116   :  { %p1075_p5 = scmp.ne.s32.totalorder %s1291_s3, %s1074_s13  ;;  %p1078_p6 = scmp.lt.u32.totalorder %s1074_s13, %s1291_s3 }
 0x118   :  { %p1080_p7 = pnand %p1078_p6, %p1075_p5 }
 0x11a   :  { %1083 = shalt.err (!%p1080_p7)
}
 0x11b   :  { %s1087_s18 = smov 128   ;;  %s1088_s19 = smov 8  }
 0x11c   :  { %729 = dma.vmem_to_hbm [thread:$0]  %s724_s10, 512, %s1291_s3, [#allocation3], %s1087_s18, %s1087_s18, %s1088_s19  }
 0x11d   :  { %1084 = dma.done.wait [#allocation3], 512  }
 0x11e   :  { %1085 = vsyncadd [#allocation3], 4294966784 }
 0x11f   :  { %733 = vsyncpa [#allocation3], 1 }

// kernel: tpu_custom_call.1
= control target key start
LH: loop header
LB: loop body
LE: loop exit
PB: predicated region body
PF: predicated region fallthrough
CT: control target
= control target key end

     0   :  { %vm34_vm0 = vcmask 523264   ;;  %s1288_s0 = inlined_call_operand.vmem [shape: f32[32,64], index: 0, kind: input, shape index: {}]   ;;  %s1289_s1 = inlined_call_operand.vmem [shape: f32[64,32], index: 1, kind: input, shape index: {}]   ;;  %s1290_s2 = inlined_call_operand.vmem [shape: f32[1,32], index: 2, kind: input, shape index: {}]   ;;  %s1291_s3 = inlined_call_operand.hbm [shape: f32[32,32], index: 3, kind: output, shape index: {}]  }
   0x1   :  { %v19_v0 = vld [vmem:[%s1289_s1] sm:$0xff]  ;;  %v20_v1 = vld [vmem:[%s1289_s1 + $0x8] sm:$0xff]  ;;  %v21_v2 = vld [vmem:[%s1289_s1 + $0x10] sm:$0xff] }
   0x2   :  { %v48_v3 = vand.u32 4294901760, %v19_v0  ;;  %v51_v4 = vand.u32 4294901760, %v20_v1  ;;  %v22_v5 = vld [vmem:[%s1289_s1 + $0x18] sm:$0xff]  ;;  %v54_v6 = vand.u32 4294901760, %v21_v2  ;;  %v23_v7 = vld [vmem:[%s1289_s1 + $0x20] sm:$0xff]  ;;  %v24_v8 = vld [vmem:[%s1289_s1 + $0x28] sm:$0xff] }
   0x3   :  { %v57_v9 = vand.u32 4294901760, %v22_v5  ;;  %v60_v10 = vand.u32 4294901760, %v23_v7  ;;  %v63_v11 = vand.u32 4294901760, %v24_v8  ;;  %v25_v12 = vld [vmem:[%s1289_s1 + $0x30] sm:$0xff]  ;;  %v1133_v13 = vld [vmem:[%s1289_s1 + $0x38] sm:$0xff]  ;;  %v15_v14 = vld [vmem:[%s1288_s0] sm:$0xff] }
   0x4   :  { %v1138_v15 = vpack.c.bf16 %v51_v4, %v48_v3  ;;  %v66_v16 = vand.u32 4294901760, %v25_v12  ;;  %v36_v17 = vsel %vm34_vm0, %v15_v14, 0  ;;  %v16_v18 = vld [vmem:[%s1288_s0 + $0x8] sm:$0xff]  ;;  %v69_v20 = vand.u32 4294901760, %v1133_v13 }
   0x5   :  { %v1144_v19 = vpack.c.bf16 %v57_v9, %v54_v6  ;;  %v1147_v21 = vand.u32 4294901760, %v36_v17  ;;  %v1149_v22 = vsub.f32 %v19_v0, %v48_v3 }
   0x6   :  { %8 = vsyncpa [#allocation3], 0  ;;  %940 = vmatprep.subr.bf16.mxu1 %v1138_v15  ;;  %988 = vmatprep.subr.bf16.mxu0 %v1138_v15  ;;  %v1153_v23 = vpack.c.bf16 %v63_v11, %v60_v10  ;;  %v1155_v24 = vsub.f32 %v20_v1, %v51_v4  ;;  %v39_v25 = vsel %vm34_vm0, %v16_v18, 0  ;;  %v1158_v26 = vsub.f32 %v21_v2, %v54_v6  ;;  %v17_v46 = vld [vmem:[%s1288_s0 + $0x10] sm:$0xff]  ;;  %v18_v52 = vld [vmem:[%s1288_s0 + $0x18] sm:$0xff]  ;;  %s1086_s9 = smov [#allocation2]  }
   0x7   :  { %942 = vmatpush3.bf16.msra.mxu1 %v1138_v15  ;;  %990 = vmatpush3.bf16.msra.mxu0 %v1138_v15  ;;  %v1163_v27 = vsub.f32 %v36_v17, %v1147_v21  ;;  %v163_v28 = vand.u32 4294901760, %v1149_v22  ;;  %v1166_v29 = vand.u32 4294901760, %v39_v25  ;;  %v1168_v30 = vsub.f32 %v22_v5, %v57_v9  ;;  %s723_s10 = sshll.u32 %s1086_s9, 4  ;;  %s724_s10 = int_to_ptr.vmem [resolvable:$true] %s723_s10 }
   0x8   :  { %944 = vmatprep.subr.bf16.mxu1 %v1144_v19  ;;  %992 = vmatprep.subr.bf16.mxu0 %v1144_v19  ;;  %v170_v31 = vand.u32 4294901760, %v1155_v24  ;;  %v177_v32 = vand.u32 4294901760, %v1158_v26  ;;  %v1174_v33 = vsub.f32 %v23_v7, %v60_v10  ;;  %v1176_v34 = vsub.f32 %v24_v8, %v63_v11  ;;  %p1067_p1 = scmp.lt.s32.totalorder %s724_s10, %s724_s10 }
   0x9   :  { %v122_v35 = vand.u32 4294901760, %v1163_v27  ;;  %v164_v36 = vsub.f32 %v1149_v22, %v163_v28  ;;  %v1181_v37 = vsub.f32 %v39_v25, %v1166_v29  ;;  %v184_v38 = vand.u32 4294901760, %v1168_v30 }
   0xa   :  { %v171_v39 = vsub.f32 %v1155_v24, %v170_v31  ;;  %v178_v40 = vsub.f32 %v1158_v26, %v177_v32  ;;  %v191_v41 = vand.u32 4294901760, %v1174_v33  ;;  %v1197_v47 = vpack.c.bf16 %v69_v20, %v66_v16 }
   0xb   :  { %946 = vmatpush3.bf16.msra.mxu1 %v1144_v19  ;;  %994 = vmatpush3.bf16.msra.mxu0 %v1144_v19  ;;  %v123_v42 = vsub.f32 %v1163_v27, %v122_v35  ;;  %v165_v43 = vand.u32 4294901760, %v164_v36  ;;  %v132_v44 = vand.u32 4294901760, %v1181_v37  ;;  %v185_v45 = vsub.f32 %v1168_v30, %v184_v38 }
   0xc   :  { %948 = vmatprep.subr.bf16.mxu1 %v1153_v23  ;;  %996 = vmatprep.subr.bf16.mxu0 %v1153_v23  ;;  %v172_v48 = vand.u32 4294901760, %v171_v39  ;;  %v1003_v50 = vpack.c.bf16 %v170_v31, %v163_v28  ;;  %v198_v51 = vand.u32 4294901760, %v1176_v34  ;;  %v179_v54 = vand.u32 4294901760, %v178_v40 }
   0xd   :  { %v124_v49 = vand.u32 4294901760, %v123_v42  ;;  %889 = vmatprep.mubr.f32.mxu0 %v122_v35  ;;  %v133_v53 = vsub.f32 %v1181_v37, %v132_v44  ;;  %v42_v55 = vsel %vm34_vm0, %v17_v46, 0  ;;  %v1205_v56 = vsub.f32 %v25_v12, %v66_v16 }
   0xe   :  { %v955_v57 = vpack.c.bf16 %v172_v48, %v165_v43  ;;  %v186_v58 = vand.u32 4294901760, %v185_v45  ;;  %v192_v59 = vsub.f32 %v1174_v33, %v191_v41  ;;  %v199_v60 = vsub.f32 %v1176_v34, %v198_v51 }
   0xf   :  { %950 = vmatpush3.bf16.msra.mxu1 %v1153_v23  ;;  %998 = vmatpush3.bf16.msra.mxu0 %v1153_v23  ;;  %v1213_v61 = vand.u32 4294901760, %v42_v55  ;;  %v205_v62 = vand.u32 4294901760, %v1205_v56  ;;  %v1217_v63 = vsub.f32 %v1133_v13, %v69_v20  ;;  %v45_v0 = vsel %vm34_vm0, %v18_v52, 0 }
  0x10   :  { %952 = vmatprep.subr.bf16.mxu1 %v1197_v47  ;;  %1000 = vmatprep.subr.bf16.mxu0 %v1197_v47  ;;  %v1220_v1 = vand.u32 4294901760, %v45_v0  ;;  %v134_v2 = vand.u32 4294901760, %v133_v53  ;;  %v959_v5 = vpack.c.bf16 %v186_v58, %v179_v54  ;;  %v1007_v6 = vpack.c.bf16 %v184_v38, %v177_v32 }
  0x11   :  { %823 = vmatprep.mubr.f32.mxu1 %v124_v49  ;;  %v1223_v3 = vsub.f32 %v42_v55, %v1213_v61  ;;  %v212_v4 = vand.u32 4294901760, %v1217_v63  ;;  %v193_v7 = vand.u32 4294901760, %v192_v59  ;;  %v200_v9 = vand.u32 4294901760, %v199_v60 }
  0x12   :  { %v1229_v8 = vsub.f32 %v45_v0, %v1220_v1  ;;  %v206_v11 = vsub.f32 %v1205_v56, %v205_v62  ;;  %v1011_v16 = vpack.c.bf16 %v198_v51, %v191_v41  ;;  %v971_v36 = vpack.c.bf16 %v1155_v24, %v1149_v22 }
  0x13   :  { %954 = vmatpush3.bf16.msra.mxu1 %v1197_v47  ;;  %1002 = vmatpush3.bf16.msra.mxu0 %v1197_v47  ;;  %v142_v10 = vand.u32 4294901760, %v1223_v3  ;;  %v213_v12 = vsub.f32 %v1217_v63, %v212_v4  ;;  %v963_v18 = vpack.c.bf16 %v200_v9, %v193_v7  ;;  %v1015_v35 = vpack.c.bf16 %v212_v4, %v205_v62 }
  0x14   :  { %956 = vmatprep.subr.bf16.mxu1 %v955_v57  ;;  %1004 = vmatprep.subr.bf16.mxu0 %v1003_v50  ;;  %v152_v13 = vand.u32 4294901760, %v1229_v8  ;;  %v207_v25 = vand.u32 4294901760, %v206_v11  ;;  %v975_v38 = vpack.c.bf16 %v1168_v30, %v1158_v26  ;;  %v979_v22 = vpack.c.bf16 %v1176_v34, %v1174_v33 }
  0x15   :  { %v143_v14 = vsub.f32 %v1223_v3, %v142_v10  ;;  %v214_v28 = vand.u32 4294901760, %v213_v12  ;;  %vm713_vm1 = vcmask 261120  }
  0x16   :  { %824 = vmatmul.mubr.f32.vlgmr.msra.gmra.mrb[0].mxu1 %v134_v2  ;;  %890 = vmatmul.mubr.f32.vlgmr.msra.gmra.mrb[0].mxu0 %v132_v44  ;;  %v153_v17 = vsub.f32 %v1229_v8, %v152_v13 }
  0x17   :  { %958 = vmatpush3.bf16.msra.mxu1 %v955_v57  ;;  %1006 = vmatpush3.bf16.msra.mxu0 %v1003_v50  ;;  %v144_v20 = vand.u32 4294901760, %v143_v14  ;;  %v967_v32 = vpack.c.bf16 %v214_v28, %v207_v25 }
  0x18   :  { %960 = vmatprep.subr.bf16.mxu1 %v959_v5  ;;  %1008 = vmatprep.subr.bf16.mxu0 %v1007_v6  ;;  %v154_v31 = vand.u32 4294901760, %v153_v17 }
  0x19   :  { %892 = vmatprep.mubr.f32.mxu0 %v142_v10  ;;  %826 = vmatprep.mubr.f32.mxu1 %v144_v20 }
  0x1a   :  { %893 = vmatmul.mubr.f32.gmra.mrb[2].mxu0 %v152_v13  ;;  %827 = vmatmul.mubr.f32.gmra.mrb[2].mxu1 %v154_v31 }
  0x1b   :  { %962 = vmatpush3.bf16.msra.mxu1 %v959_v5  ;;  %1010 = vmatpush3.bf16.msra.mxu0 %v1007_v6 }
  0x1c   :  { %964 = vmatprep.subr.bf16.mxu1 %v963_v18  ;;  %1012 = vmatprep.subr.bf16.mxu0 %v1011_v16 }
  0x1d   :  { %911 = vmatprep.mubr.f32.mxu0 %v1147_v21  ;;  %845 = vmatprep.mubr.f32.mxu1 %v1147_v21 }
  0x1f   :  { %966 = vmatpush3.bf16.msra.mxu1 %v963_v18  ;;  %1014 = vmatpush3.bf16.msra.mxu0 %v1011_v16 }
  0x20   :  { %968 = vmatprep.subr.bf16.mxu1 %v967_v32  ;;  %1016 = vmatprep.subr.bf16.mxu0 %v1015_v35 }
  0x23   :  { %970 = vmatpush3.bf16.msra.mxu1 %v967_v32  ;;  %1018 = vmatpush3.bf16.msra.mxu0 %v1015_v35 }
  0x24   :  { %972 = vmatprep.subr.bf16.mxu1 %v971_v36  ;;  %1020 = vmatprep.subr.bf16.mxu0 %v1138_v15 }
  0x26   :  { %846 = vmatmul.mubr.f32.vlgmr.msra.gmra.mrb[0].mxu1 %v1166_v29  ;;  %912 = vmatmul.mubr.f32.vlgmr.msra.gmra.mrb[0].mxu0 %v1166_v29 }
  0x27   :  { %974 = vmatpush3.bf16.msra.mxu1 %v971_v36  ;;  %1022 = vmatpush3.bf16.msra.mxu0 %v1138_v15  ;;  %v983_v15 = vpack.c.bf16 %v1217_v63, %v1205_v56 }
  0x28   :  { %976 = vmatprep.subr.bf16.mxu1 %v975_v38  ;;  %1024 = vmatprep.subr.bf16.mxu0 %v1144_v19 }
  0x29   :  { %848 = vmatprep.mubr.f32.mxu1 %v1213_v61  ;;  %914 = vmatprep.mubr.f32.mxu0 %v1213_v61 }
  0x2a   :  { %849 = vmatmul.mubr.f32.gmra.mrb[2].mxu1 %v1220_v1  ;;  %915 = vmatmul.mubr.f32.gmra.mrb[2].mxu0 %v1220_v1 }
  0x2b   :  { %978 = vmatpush3.bf16.msra.mxu1 %v975_v38  ;;  %1026 = vmatpush3.bf16.msra.mxu0 %v1144_v19  ;;  %v734_v19 = vld [vmem:[%s1290_s2] ss:$0 sm:$0xff]  ;;  %s1062_s2 = scalar_lea.vmem %s724_s10, 512 }
  0x2c   :  { %980 = vmatprep.subr.bf16.mxu1 %v979_v22  ;;  %1028 = vmatprep.subr.bf16.mxu0 %v1153_v23  ;;  %p1063_p0 = scmp.ne.s32.totalorder %s724_s10, %s1062_s2  ;;  %p1068_p2 = scmp.lt.s32.totalorder %s1062_s2, %s1062_s2 }
  0x2d   :  { %867 = vmatprep.mubr.f32.mxu1 %v1163_v27  ;;  %933 = vmatprep.mubr.f32.mxu0 %v1147_v21 }
  0x2e   :  { %p1069_p3 = por %p1068_p2, %p1067_p1 }
  0x2f   :  { %982 = vmatpush3.bf16.msra.mxu1 %v979_v22  ;;  %1030 = vmatpush3.bf16.msra.mxu0 %v1153_v23 }
  0x30   :  { %984 = vmatprep.subr.bf16.mxu1 %v983_v15  ;;  %1032 = vmatprep.subr.bf16.mxu0 %v1197_v47  ;;  %p1070_p4 = pnand %p1069_p3, %p1063_p0 }
  0x33   :  { %986 = vmatpush3.bf16.msra.mxu1 %v983_v15  ;;  %1034 = vmatpush3.bf16.msra.mxu0 %v1197_v47 }
  0x36   :  { %868 = vmatmul.mubr.f32.vlgmr.msra.gmra.mrb[0].mxu1 %v1181_v37  ;;  %934 = vmatmul.mubr.f32.vlgmr.msra.gmra.mrb[0].mxu0 %v1166_v29 }
  0x37   :  { %870 = vmatprep.mubr.f32.mxu1 %v1223_v3  ;;  %936 = vmatprep.mubr.f32.mxu0 %v1213_v61 }
  0x3a   :  { %871 = vmatmul.mubr.f32.gmra.mrb[2].mxu1 %v1229_v8  ;;  %937 = vmatmul.mubr.f32.gmra.mrb[2].mxu0 %v1220_v1 }
 0x109   :  { %v869_v21 = vpop.f32.mrb[0].mxu1  ;;  %v935_v23 = vpop.f32.mrb[0].mxu0 }
 0x10a   :  { %v1035_v24 = vadd.f32 %v869_v21, %v734_v19  ;;  %v373_v26 = vpop.f32.mrb[1].mxu1  ;;  %v691_v27 = vpop.f32.mrb[1].mxu0 }
 0x10b   :  { %v1037_v30 = vadd.f32 %v734_v19, %v373_v26 }
 0x10c   :  { %v1036_v29 = vadd.f32 %v1035_v24, %v935_v23 }
 0x10d   :  { %v1038_v33 = vadd.f32 %v1037_v30, %v691_v27  ;;  %v872_v34 = vpop.f32.mrb[2].mxu1  ;;  %v938_v37 = vpop.f32.mrb[2].mxu0 }
 0x10e   :  { %715 = vst.msk [vmem:[#allocation2 + $0x8] sm:$0xff] %vm713_vm1, %v1036_v29  ;;  %v1039_v39 = vadd.f32 %v872_v34, %v734_v19  ;;  %v387_v40 = vpop.f32.mrb[3].mxu1  ;;  %v703_v41 = vpop.f32.mrb[3].mxu0 }
 0x10f   :  { %714 = vst.msk [vmem:[#allocation2] sm:$0xff] %vm713_vm1, %v1038_v33  ;;  %v1041_v42 = vadd.f32 %v734_v19, %v387_v40 }
 0x110   :  { %v1040_v43 = vadd.f32 %v1039_v39, %v938_v37 }
 0x111   :  { %v1042_v44 = vadd.f32 %v1041_v42, %v703_v41 }
 0x112   :  { %717 = vst.msk [vmem:[#allocation2 + $0x18] sm:$0xff] %vm713_vm1, %v1040_v43 }
 0x113   :  { %716 = vst.msk [vmem:[#allocation2 + $0x10] sm:$0xff] %vm713_vm1, %v1042_v44 }
 0x114   :  { %1073 = shalt.err (!%p1070_p4)
}
 0x115   :  { %s1074_s13 = scalar_lea.hbm %s1291_s3, 512 }
 0x116   :  { %p1075_p5 = scmp.ne.s32.totalorder %s1291_s3, %s1074_s13  ;;  %p1078_p6 = scmp.lt.u32.totalorder %s1074_s13, %s1291_s3 }
 0x118   :  { %p1080_p7 = pnand %p1078_p6, %p1075_p5 }
 0x11a   :  { %1083 = shalt.err (!%p1080_p7)
}
 0x11b   :  { %s1087_s18 = smov 128   ;;  %s1088_s19 = smov 8  }
 0x11c   :  { %729 = dma.vmem_to_hbm [thread:$0]  %s724_s10, 512, %s1291_s3, [#allocation3], %s1087_s18, %s1087_s18, %s1088_s19  }
 0x11d   :  { %1084 = dma.done.wait [#allocation3], 512  }
 0x11e   :  { %1085 = vsyncadd [#allocation3], 4294966784 }
 0x11f   :  { %733 = vsyncpa [#allocation3], 1 }

</bundles_post_ra>
